<compile_context>
chip_gen: v5e
topology: v5e:2x2
jax: 0.10.0
libtpu: 0.0.40
codegen_flags: <defaults>
</compile_context>

<pallas_src>
import numpy as np
import jax
import jax.numpy as jnp
from jax.experimental import pallas as pl
from jax.experimental.pallas import tpu as pltpu


# ----------------------------------------------------------------------------
# Masks (identical to VerticalStackConvolutionR / HorizontalStackConvolutionR
# with mask_center=True, kernel_size=3), in OIHW layout.
# ----------------------------------------------------------------------------
def _vertical_mask(c_in, c_out, k=3):
    m = np.ones((c_out, c_in, k, k), np.float32)
    m[:, :, k // 2 + 1:, :] = 0.0
    m[:c_out // 3, :, k // 2, :] = 0.0
    m[c_out // 3:2 * c_out // 3, c_in // 3:, k // 2, :] = 0.0
    m[2 * c_out // 3:, 2 * c_in // 3:, k // 2, :] = 0.0
    return m


def _horizontal_mask(c_in, c_out, k=3):
    m = np.ones((c_out, c_in, 1, k), np.float32)
    m[:, :, 0, k // 2 + 1:] = 0.0
    m[:c_out // 3, :, 0, k // 2] = 0.0
    m[c_out // 3:2 * c_out // 3, c_in // 3:, 0, k // 2] = 0.0
    m[2 * c_out // 3:, 2 * c_in // 3:, 0, k // 2] = 0.0
    return m


# ----------------------------------------------------------------------------
# Kernel factory: one grid step = (one batch element) x (one spatial tile of T
# positions).  Activation refs are lane-dense: last dim is the spatial tile T.
# ----------------------------------------------------------------------------
def _make_gated_kernel(C, Cp, precision):
    def kernel(tv_ref, th_ref, hres_ref, w_tv_ref, w_th_ref, wh1_ref,
               vout_ref, hout_ref):
        tv = tv_ref[0]        # (6C+1, T): 6 vertical taps + ones channel
        th = th_ref[0]        # (2C,   T): 2 horizontal taps

        def mm(w_ref, x):     # MXU matmul, f32 accumulation
            return jnp.dot(w_ref[...], x, precision=precision,
                           preferred_element_type=jnp.float32)

        # One fused matmul per streamed operand (biases ride on the ones row).
        big = mm(w_tv_ref, tv)        # (4*Cp, T) = [v_val; v_gate; hc_val; hc_gate]
        small = mm(w_th_ref, th)      # (2*Cp, T) = [hh_val; hh_gate]

        v_val, v_gate = big[:Cp], big[Cp:2 * Cp]            # aligned sublane slices
        h_val = big[2 * Cp:3 * Cp] + small[:Cp]
        h_gate = big[3 * Cp:] + small[Cp:]

        # ---- vertical stack output ----------------------------------------
        v_act = jnp.tanh(v_val) * jax.nn.sigmoid(v_gate)    # (Cp, T) f32
        vout_ref[0] = v_act[:C].astype(vout_ref.dtype)

        # ---- horizontal stack: gate -> 1x1 conv -> +residual (bias folded) -
        gated = jnp.tanh(h_val) * jax.nn.sigmoid(h_gate)    # pad rows are exactly 0
        h_lin = mm(wh1_ref, gated.astype(wh1_ref.dtype))    # (Cp, T)
        hout_ref[0] = (h_lin[:C] + hres_ref[0]).astype(hout_ref.dtype)

    return kernel


# ----------------------------------------------------------------------------
# One-time host-side weight preparation: masking, tap fusion, 1x1 folding,
# bias folding (ones-row column), sublane-aligned stacking, dtype cast.
# ----------------------------------------------------------------------------
def prepare_params(params, compute_dtype=jnp.bfloat16):
    C2 = params["bv"].shape[0]
    C = C2 // 2
    if C % 3 != 0:
        raise ValueError("c_in must be divisible by 3 (R/G/B channel groups)")
    Cp = -(-C // 8) * 8        # pad each row-block to the f32 sublane quantum
    hi = jax.lax.Precision.HIGHEST

    wv = params["wv_oihw"] * params["mask_v"]              # (2C, C, 3, 3)
    wh = params["wh_oihw"] * params["mask_h"]              # (2C, C, 1, 3)
    wv2h = params["wv2h_oihw"][:, :, 0, 0]                 # (2C, 2C)
    wh1 = params["wh1_oihw"][:, :, 0, 0]                   # (C, C)

    # Fused tap weights, columns tap-major / channel-minor (matches wrapper).
    wv_f = jnp.transpose(wv[:, :, :2, :], (0, 2, 3, 1)).reshape(C2, 6 * C)
    wh_f = jnp.transpose(wh[:, :, 0, :2], (0, 2, 1)).reshape(C2, 2 * C)
    wc_f = jnp.matmul(wv2h, wv_f, precision=hi)            # fold 1x1 v->h into taps

    bv = params["bv"]
    bh_total = params["bh"] + params["bv2h"] + jnp.matmul(wv2h, bv, precision=hi)

    def blk(w, b=None):                                    # (C,K)[,(C,)] -> (Cp,K[+1])
        if b is not None:
            w = jnp.concatenate([w, b[:, None]], axis=1)   # bias column for ones row
        return jnp.pad(w, ((0, Cp - w.shape[0]), (0, 0)))

    w_tv = jnp.concatenate(                                # (4*Cp, 6C+1)
        [blk(wv_f[:C], bv[:C]), blk(wv_f[C:], bv[C:]),
         blk(wc_f[:C], bh_total[:C]), blk(wc_f[C:], bh_total[C:])], axis=0)
    w_th = jnp.concatenate([blk(wh_f[:C]), blk(wh_f[C:])], axis=0)   # (2*Cp, 2C)
    wh1_p = jnp.pad(wh1, ((0, Cp - C), (0, Cp - C)))                 # (Cp, Cp)

    return dict(w_tv=w_tv.astype(compute_dtype),
                w_th=w_th.astype(compute_dtype),
                wh1=wh1_p.astype(compute_dtype),
                bh1=params["bh1"].astype(jnp.float32))


def _pick_spatial_tile(hw, n_batch, bytes_per_pos, budget=24 << 20):
    """Largest lane-dense tile fitting the (double-buffered) VMEM budget."""
    cands = [t for t in (2048, 1024, 512, 256, 128) if hw % t == 0]
    if not cands:
        return hw                          # full-extent block (no 128 multiple)
    fits = [t for t in cands if 2 * bytes_per_pos * t <= budget]
    if not fits:
        return cands[-1]
    if n_batch == 1:                       # only then do we need >=2 spatial steps
        multi = [t for t in fits if hw // t >= 2]
        if multi:
            return multi[0]
    return fits[0]


# ----------------------------------------------------------------------------
# Forward wrapper.  v_stack / h_stack: (N, C, H, W) float32 (PyTorch NCHW).
# ----------------------------------------------------------------------------
def gated_masked_conv(v_stack, h_stack, prep, out_dtype=jnp.float32):
    N, C, H, W = v_stack.shape
    HW = H * W
    cdt = prep["w_tv"].dtype
    Cp = prep["wh1"].shape[0]
    assert prep["w_tv"].shape == (4 * Cp, 6 * C + 1), "prep/params channel mismatch"

    precision = (jax.lax.Precision.HIGHEST
                 if jnp.dtype(cdt) == jnp.dtype(jnp.float32)
                 else jax.lax.Precision.DEFAULT)

    # im2col-lite in the compute dtype; ones channel carries the folded biases.
    vpad = jnp.pad(v_stack.astype(cdt), ((0, 0), (0, 0), (1, 1), (1, 1)))
    taps = [vpad[:, :, kh:kh + H, kw:kw + W] for kh in range(2) for kw in range(3)]
    taps.append(jnp.ones((N, 1, H, W), cdt))
    tv = jnp.concatenate(taps, axis=1).reshape(N, 6 * C + 1, HW)

    hpad = jnp.pad(h_stack.astype(cdt), ((0, 0), (0, 0), (0, 0), (1, 1)))
    th = jnp.concatenate([hpad[:, :, :, kw:kw + W] for kw in range(2)],
                         axis=1).reshape(N, 2 * C, HW)

    # Residual with the output-1x1 bias folded in (kept f32 for exactness).
    hres = (h_stack + prep["bh1"][None, :, None, None]).reshape(N, C, HW)

    act_bytes = jnp.dtype(cdt).itemsize
    out_bytes = jnp.dtype(out_dtype).itemsize
    bytes_per_pos = (6 * C + 1 + 2 * C) * act_bytes + C * 4 + 2 * C * out_bytes
    T = _pick_spatial_tile(HW, N, bytes_per_pos)
    grid = (N, HW // T)

    weight_bytes = (prep["w_tv"].size + prep["w_th"].size + prep["wh1"].size) * act_bytes
    vmem_limit = int(min(max(4 * bytes_per_pos * T + 2 * weight_bytes, 32 << 20),
                         48 << 20))

    act = lambda c: pl.BlockSpec((1, c, T), lambda n, s: (n, 0, s))
    # Grid-invariant weights: single-buffered (no point double-buffering constants).
    wspec = lambda a: pl.BlockSpec(a.shape, lambda n, s: (0, 0),
                                   pipeline_mode=pl.Buffered(1))

    v_out, h_out = pl.pallas_call(
        _make_gated_kernel(C, Cp, precision),
        out_shape=(jax.ShapeDtypeStruct((N, C, HW), out_dtype),
                   jax.ShapeDtypeStruct((N, C, HW), out_dtype)),
        grid=grid,
        in_specs=[act(6 * C + 1),                 # tv (taps + ones channel)
                  act(2 * C),                     # th
                  act(C),                         # residual (+bh1)
                  wspec(prep["w_tv"]),            # stacked vertical-path weights
                  wspec(prep["w_th"]),            # stacked horizontal-path weights
                  wspec(prep["wh1"])],            # output 1x1 (padded to Cp)
        out_specs=(act(C), act(C)),
        compiler_params=pltpu.CompilerParams(
            dimension_semantics=("parallel", "parallel"),
            vmem_limit_bytes=vmem_limit),
    )(tv, th, hres, prep["w_tv"], prep["w_th"], prep["wh1"])

    return v_out.reshape(N, C, H, W), h_out.reshape(N, C, H, W)


# ----------------------------------------------------------------------------
# Pure-JAX reference (mirrors the PyTorch forward) for correctness check.
# ----------------------------------------------------------------------------
def _ref_forward(v, h, params):
    dn = ("NCHW", "OIHW", "NCHW")
    prec = jax.lax.Precision.HIGHEST

    def conv(x, w, b, pad):
        y = jax.lax.conv_general_dilated(x, w, (1, 1), pad,
                                         dimension_numbers=dn, precision=prec)
        return y + b[None, :, None, None]

    wv = params["wv_oihw"] * params["mask_v"]
    wh = params["wh_oihw"] * params["mask_h"]

    v_feat = conv(v, wv, params["bv"], [(1, 1), (1, 1)])
    v_val, v_gate = jnp.split(v_feat, 2, axis=1)
    v_out = jnp.tanh(v_val) * jax.nn.sigmoid(v_gate)

    h_feat = conv(h, wh, params["bh"], [(0, 0), (1, 1)])
    h_feat = h_feat + conv(v_feat, params["wv2h_oihw"], params["bv2h"],
                           [(0, 0), (0, 0)])
    h_val, h_gate = jnp.split(h_feat, 2, axis=1)
    gated = jnp.tanh(h_val) * jax.nn.sigmoid(h_gate)
    h_out = conv(gated, params["wh1_oihw"], params["bh1"],
                 [(0, 0), (0, 0)]) + h
    return v_out, h_out


def _init_params(key, c_in):
    c_out = 2 * c_in
    ks = jax.random.split(key, 8)
    s = 0.2
    return {
        "wv_oihw": s * jax.random.normal(ks[0], (c_out, c_in, 3, 3), jnp.float32),
        "bv": s * jax.random.normal(ks[1], (c_out,), jnp.float32),
        "wh_oihw": s * jax.random.normal(ks[2], (c_out, c_in, 1, 3), jnp.float32),
        "bh": s * jax.random.normal(ks[3], (c_out,), jnp.float32),
        "wv2h_oihw": s * jax.random.normal(ks[4], (c_out, c_out, 1, 1), jnp.float32),
        "bv2h": s * jax.random.normal(ks[5], (c_out,), jnp.float32),
        "wh1_oihw": s * jax.random.normal(ks[6], (c_in, c_in, 1, 1), jnp.float32),
        "bh1": s * jax.random.normal(ks[7], (c_in,), jnp.float32),
        "mask_v": jnp.asarray(_vertical_mask(c_in, c_out)),
        "mask_h": jnp.asarray(_horizontal_mask(c_in, c_out)),
    }


if __name__ == "__main__":
    N, C, H, W = 2, 6, 16, 16          # c_in must be divisible by 3
    key = jax.random.PRNGKey(0)
    k_v, k_h, k_p = jax.random.split(key, 3)
    v_stack = jax.random.normal(k_v, (N, C, H, W), jnp.float32)
    h_stack = jax.random.normal(k_h, (N, C, H, W), jnp.float32)
    params = _init_params(k_p, C)

    v_ref, h_ref = _ref_forward(v_stack, h_stack, params)

    fwd = jax.jit(gated_masked_conv, static_argnames=("out_dtype",))

    # --- f32 compute path (strict check; kernel matmuls at HIGHEST) ---------
    prep_f32 = prepare_params(params, jnp.float32)
    v32, h32 = fwd(v_stack, h_stack, prep_f32)
    jax.block_until_ready((v32, h32))
    np.testing.assert_allclose(np.asarray(v32), np.asarray(v_ref),
                               rtol=2e-3, atol=2e-3)
    np.testing.assert_allclose(np.asarray(h32), np.asarray(h_ref),
                               rtol=2e-3, atol=2e-3)

    # --- bf16 operand + bf16 output path (recommended on v5e/v6e/v7x:
    #     the kernel is HBM-bandwidth-bound; gating math stays f32) ----------
    prep_bf16 = prepare_params(params, jnp.bfloat16)
    v16, h16 = fwd(v_stack, h_stack, prep_bf16, out_dtype=jnp.bfloat16)
    jax.block_until_ready((v16, h16))
    np.testing.assert_allclose(np.asarray(v16.astype(jnp.float32)),
                               np.asarray(v_ref), rtol=5e-2, atol=5e-2)
    np.testing.assert_allclose(np.asarray(h16.astype(jnp.float32)),
                               np.asarray(h_ref), rtol=5e-2, atol=5e-2)

    print("KERNEL_OK")
</pallas_src>

<mosaic_0001>
module attributes {stable_mosaic.version = 11 : i64} {
  func.func @kernel(%arg0: i32, %arg1: i32, %arg2: memref<1x37x256xf32, #tpu.memory_space<vmem>>, %arg3: memref<1x12x256xf32, #tpu.memory_space<vmem>>, %arg4: memref<1x6x256xf32, #tpu.memory_space<vmem>>, %arg5: memref<32x37xf32, #tpu.memory_space<vmem>>, %arg6: memref<16x12xf32, #tpu.memory_space<vmem>>, %arg7: memref<8x8xf32, #tpu.memory_space<vmem>>, %arg8: memref<1x6x256xf32, #tpu.memory_space<vmem>>, %arg9: memref<1x6x256xf32, #tpu.memory_space<vmem>>) attributes {dimension_semantics = [#tpu.dimension_semantics<parallel>, #tpu.dimension_semantics<parallel>], iteration_bounds = array<i64: 2, 1>, scalar_prefetch = 0 : i64, scratch_operands = 0 : i64, tpu.core_type = #tpu.core_type<tc>, window_params = [{transform_indices = @transform_0, window_bounds = array<i64: 1, 37, 256>}, {transform_indices = @transform_1, window_bounds = array<i64: 1, 12, 256>}, {transform_indices = @transform_2, window_bounds = array<i64: 1, 6, 256>}, {pipeline_mode = #tpu.pipeline_mode<synchronous>, transform_indices = @transform_3, window_bounds = array<i64: 32, 37>}, {pipeline_mode = #tpu.pipeline_mode<synchronous>, transform_indices = @transform_4, window_bounds = array<i64: 16, 12>}, {pipeline_mode = #tpu.pipeline_mode<synchronous>, transform_indices = @transform_5, window_bounds = array<i64: 8, 8>}, {transform_indices = @transform_6, window_bounds = array<i64: 1, 6, 256>}, {transform_indices = @transform_7, window_bounds = array<i64: 1, 6, 256>}]} {
    %c0 = arith.constant 0 : index
    %c0_0 = arith.constant 0 : index
    %c0_1 = arith.constant 0 : index
    %0 = vector.load %arg2[%c0, %c0_0, %c0_1] : memref<1x37x256xf32, #tpu.memory_space<vmem>>, vector<1x37x256xf32>
    %1 = vector.shape_cast %0 : vector<1x37x256xf32> to vector<37x256xf32>
    %c0_2 = arith.constant 0 : index
    %c0_3 = arith.constant 0 : index
    %c0_4 = arith.constant 0 : index
    %2 = vector.load %arg3[%c0_2, %c0_3, %c0_4] : memref<1x12x256xf32, #tpu.memory_space<vmem>>, vector<1x12x256xf32>
    %3 = vector.shape_cast %2 : vector<1x12x256xf32> to vector<12x256xf32>
    %c0_5 = arith.constant 0 : index
    %c0_6 = arith.constant 0 : index
    %4 = vector.load %arg5[%c0_5, %c0_6] : memref<32x37xf32, #tpu.memory_space<vmem>>, vector<32x37xf32>
    %cst = arith.constant dense<0.000000e+00> : vector<32x256xf32>
    %5 = tpu.matmul %4, %1, %cst {dimension_numbers = #tpu.dot_dimension_numbers<[1], [0], [0], [1], [0, 0, 1, 1], [], []>, precision = #tpu.contract_precision<fp32>} : vector<32x37xf32>, vector<37x256xf32>, vector<32x256xf32> -> vector<32x256xf32>
    %c0_7 = arith.constant 0 : index
    %c0_8 = arith.constant 0 : index
    %6 = vector.load %arg6[%c0_7, %c0_8] : memref<16x12xf32, #tpu.memory_space<vmem>>, vector<16x12xf32>
    %cst_9 = arith.constant dense<0.000000e+00> : vector<16x256xf32>
    %7 = tpu.matmul %6, %3, %cst_9 {dimension_numbers = #tpu.dot_dimension_numbers<[1], [0], [0], [1], [0, 0, 1, 1], [], []>, precision = #tpu.contract_precision<fp32>} : vector<16x12xf32>, vector<12x256xf32>, vector<16x256xf32> -> vector<16x256xf32>
    %8 = vector.extract_strided_slice %5 {offsets = [0, 0], sizes = [8, 256], strides = [1, 1]} : vector<32x256xf32> to vector<8x256xf32>
    %9 = vector.extract_strided_slice %5 {offsets = [8, 0], sizes = [8, 256], strides = [1, 1]} : vector<32x256xf32> to vector<8x256xf32>
    %10 = vector.extract_strided_slice %5 {offsets = [16, 0], sizes = [8, 256], strides = [1, 1]} : vector<32x256xf32> to vector<8x256xf32>
    %11 = vector.extract_strided_slice %7 {offsets = [0, 0], sizes = [8, 256], strides = [1, 1]} : vector<16x256xf32> to vector<8x256xf32>
    %12 = arith.addf %10, %11 : vector<8x256xf32>
    %13 = vector.extract_strided_slice %5 {offsets = [24, 0], sizes = [8, 256], strides = [1, 1]} : vector<32x256xf32> to vector<8x256xf32>
    %14 = vector.extract_strided_slice %7 {offsets = [8, 0], sizes = [8, 256], strides = [1, 1]} : vector<16x256xf32> to vector<8x256xf32>
    %15 = arith.addf %13, %14 : vector<8x256xf32>
    %16 = math.tanh %8 : vector<8x256xf32>
    %17 = arith.negf %9 : vector<8x256xf32>
    %18 = math.exp %17 : vector<8x256xf32>
    %cst_10 = arith.constant 1.000000e+00 : f32
    %19 = vector.broadcast %cst_10 : f32 to vector<8x256xf32>
    %20 = arith.addf %19, %18 : vector<8x256xf32>
    %21 = arith.divf %19, %20 : vector<8x256xf32>
    %22 = arith.mulf %16, %21 : vector<8x256xf32>
    %23 = vector.extract_strided_slice %22 {offsets = [0, 0], sizes = [6, 256], strides = [1, 1]} : vector<8x256xf32> to vector<6x256xf32>
    %c0_11 = arith.constant 0 : index
    %c0_12 = arith.constant 0 : index
    %c0_13 = arith.constant 0 : index
    %24 = vector.load %arg8[%c0_11, %c0_12, %c0_13] : memref<1x6x256xf32, #tpu.memory_space<vmem>>, vector<1x6x256xf32>
    %25 = vector.shape_cast %24 : vector<1x6x256xf32> to vector<6x256xf32>
    %26 = vector.shape_cast %23 : vector<6x256xf32> to vector<1x6x256xf32>
    tpu.vector_store %arg8[%c0_11, %c0_12, %c0_13], %26 {strides = array<i32>} : memref<1x6x256xf32, #tpu.memory_space<vmem>>, vector<1x6x256xf32>,
    %27 = math.tanh %12 : vector<8x256xf32>
    %28 = arith.negf %15 : vector<8x256xf32>
    %29 = math.exp %28 : vector<8x256xf32>
    %cst_14 = arith.constant 1.000000e+00 : f32
    %30 = vector.broadcast %cst_14 : f32 to vector<8x256xf32>
    %31 = arith.addf %30, %29 : vector<8x256xf32>
    %32 = arith.divf %30, %31 : vector<8x256xf32>
    %33 = arith.mulf %27, %32 : vector<8x256xf32>
    %c0_15 = arith.constant 0 : index
    %c0_16 = arith.constant 0 : index
    %34 = vector.load %arg7[%c0_15, %c0_16] : memref<8x8xf32, #tpu.memory_space<vmem>>, vector<8x8xf32>
    %cst_17 = arith.constant dense<0.000000e+00> : vector<8x256xf32>
    %35 = tpu.matmul %34, %33, %cst_17 {dimension_numbers = #tpu.dot_dimension_numbers<[1], [0], [0], [1], [0, 0, 1, 1], [], []>, precision = #tpu.contract_precision<fp32>} : vector<8x8xf32>, vector<8x256xf32>, vector<8x256xf32> -> vector<8x256xf32>
    %36 = vector.extract_strided_slice %35 {offsets = [0, 0], sizes = [6, 256], strides = [1, 1]} : vector<8x256xf32> to vector<6x256xf32>
    %c0_18 = arith.constant 0 : index
    %c0_19 = arith.constant 0 : index
    %c0_20 = arith.constant 0 : index
    %37 = vector.load %arg4[%c0_18, %c0_19, %c0_20] : memref<1x6x256xf32, #tpu.memory_space<vmem>>, vector<1x6x256xf32>
    %38 = vector.shape_cast %37 : vector<1x6x256xf32> to vector<6x256xf32>
    %39 = arith.addf %36, %38 : vector<6x256xf32>
    %c0_21 = arith.constant 0 : index
    %c0_22 = arith.constant 0 : index
    %c0_23 = arith.constant 0 : index
    %40 = vector.load %arg9[%c0_21, %c0_22, %c0_23] : memref<1x6x256xf32, #tpu.memory_space<vmem>>, vector<1x6x256xf32>
    %41 = vector.shape_cast %40 : vector<1x6x256xf32> to vector<6x256xf32>
    %42 = vector.shape_cast %39 : vector<6x256xf32> to vector<1x6x256xf32>
    tpu.vector_store %arg9[%c0_21, %c0_22, %c0_23], %42 {strides = array<i32>} : memref<1x6x256xf32, #tpu.memory_space<vmem>>, vector<1x6x256xf32>,
    return
  }
  func.func @transform_0(%arg0: i32, %arg1: i32) -> (i32, i32, i32) {
    %c0_i32 = arith.constant 0 : i32
    %c0_i32_0 = arith.constant 0 : i32
    return %arg0, %c0_i32, %arg1 : i32, i32, i32
  }
  func.func @transform_1(%arg0: i32, %arg1: i32) -> (i32, i32, i32) {
    %c0_i32 = arith.constant 0 : i32
    %c0_i32_0 = arith.constant 0 : i32
    return %arg0, %c0_i32, %arg1 : i32, i32, i32
  }
  func.func @transform_2(%arg0: i32, %arg1: i32) -> (i32, i32, i32) {
    %c0_i32 = arith.constant 0 : i32
    %c0_i32_0 = arith.constant 0 : i32
    return %arg0, %c0_i32, %arg1 : i32, i32, i32
  }
  func.func @transform_3(%arg0: i32, %arg1: i32) -> (i32, i32) {
    %c0_i32 = arith.constant 0 : i32
    %c0_i32_0 = arith.constant 0 : i32
    %c0_i32_1 = arith.constant 0 : i32
    return %c0_i32, %c0_i32_0 : i32, i32
  }
  func.func @transform_4(%arg0: i32, %arg1: i32) -> (i32, i32) {
    %c0_i32 = arith.constant 0 : i32
    %c0_i32_0 = arith.constant 0 : i32
    %c0_i32_1 = arith.constant 0 : i32
    return %c0_i32, %c0_i32_0 : i32, i32
  }
  func.func @transform_5(%arg0: i32, %arg1: i32) -> (i32, i32) {
    %c0_i32 = arith.constant 0 : i32
    %c0_i32_0 = arith.constant 0 : i32
    %c0_i32_1 = arith.constant 0 : i32
    return %c0_i32, %c0_i32_0 : i32, i32
  }
  func.func @transform_6(%arg0: i32, %arg1: i32) -> (i32, i32, i32) {
    %c0_i32 = arith.constant 0 : i32
    %c0_i32_0 = arith.constant 0 : i32
    return %arg0, %c0_i32, %arg1 : i32, i32, i32
  }
  func.func @transform_7(%arg0: i32, %arg1: i32) -> (i32, i32, i32) {
    %c0_i32 = arith.constant 0 : i32
    %c0_i32_0 = arith.constant 0 : i32
    return %arg0, %c0_i32, %arg1 : i32, i32, i32
  }
}

</mosaic_0001>

<bundles_post_ra>
// kernel: gated_masked_conv.1
= control target key start
LH: loop header
LB: loop body
LE: loop exit
PB: predicated region body
PF: predicated region fallthrough
CT: control target
= control target key end

     0   :  { %s2133_s24 = smov 0   ;;  %s2135_s25 = smov 0   ;;  %s2519_s0 = inlined_call_operand.vmem [shape: f32[2,37,256], index: 0, kind: input, shape index: {}]   ;;  %s2520_s1 = inlined_call_operand.vmem [shape: f32[2,12,256], index: 1, kind: input, shape index: {}]   ;;  %s2521_s2 = inlined_call_operand.vmem [shape: f32[2,6,256], index: 2, kind: input, shape index: {}]   ;;  %s2522_s3 = inlined_call_operand.vmem [shape: f32[32,37], index: 3, kind: input, shape index: {}]   ;;  %s2523_s4 = inlined_call_operand.vmem [shape: f32[16,12], index: 4, kind: input, shape index: {}]   ;;  %s2524_s5 = inlined_call_operand.vmem [shape: f32[8,8], index: 5, kind: input, shape index: {}]   ;;  %s2525_s6 = inlined_call_operand.vmem [shape: f32[2,6,256], index: 6, kind: output, shape index: {0}]   ;;  %s2526_s7 = inlined_call_operand.vmem [shape: f32[2,6,256], index: 7, kind: output, shape index: {1}]  }
   0x1   :  { %s2137_s26 = smov 0  }
   0x2 LB: > { %s30_s27 = sadd.s32 1, %s2087_s25  ;;  %p2000_p0 = scmp.ge.s32.totalorder %s2091_s26, 1  ;;  %s2091_s26 = sphi %s2137_s26, %s18_s26   ;;  %s2087_s25 = sphi %s2135_s25, %s2528_s25   ;;  %s2083_s24 = sphi %s2133_s24, %s2527_s24  }
   0x3   : > { %p32_p1 = scmp.ge.s32.totalorder %s30_s27, 2  ;;  %p297_p2 = scmp.lt.s32.totalorder %s2091_s26, 3 }
   0x5   : > { %s2530_s27 = smov (%p32_p1, %s30_s27), 0  ;;  %p298_p3 = pnand %p2000_p0, %p297_p2 }
   0x6   : > { %p365_p4 = scmp.lt.s32.totalorder (!%p298_p3), %s2083_s24, 1 }
   0x7   : > { %301 = sbr.rel (%p298_p3) target bundleno = 494 (0x1ee), region = 44 }
   0xc   : > { %v428_v0 = vld [vmem:[%s2522_s3] sm:$0xff]  ;;  %vm432_vm0 = vcmask 302080   ;;  %v429_v1 = vld [vmem:[%s2522_s3 + $0x8] sm:$0xff]  ;;  %s2532_s24 = smov (!%p365_p4, %s2083_s24), 1  ;;  %vm445_vm1 = vcmask 1044480   ;;  %v430_v7 = vld [vmem:[%s2522_s3 + $0x10] sm:$0xff] }
   0xd   : > { %v434_v2 = vsel %vm432_vm0, %v428_v0, 0  ;;  %v437_v4 = vsel %vm432_vm0, %v429_v1, 0  ;;  %s2020_s9 = smul.u32 80, %s2532_s24  ;;  %v440_v29 = vsel %vm432_vm0, %v430_v7, 0  ;;  %v431_v56 = vld [vmem:[%s2522_s3 + $0x18] sm:$0xff]  ;;  %s2016_s17 = sshll.u32 %s2532_s24, 5 }
   0xe   : > { %v2160_v3 = vand.u32 4294901760, %v434_v2  ;;  %v2172_v6 = vand.u32 4294901760, %v437_v4  ;;  %v2240_v40 = vand.u32 4294901760, %v440_v29  ;;  %s2397_s20 = scalar_lea.vmem %s2520_s1, %s2016_s17  ;;  %vm1043_vm2 = vcmask 1043456   ;;  %s2452_s29 = sshll.u32 %s2532_s24, 4 }
   0xf   : > { %s2170_s12 = scalar_lea.vmem %s2519_s0, %s2020_s9  ;;  %vm1036_vm3 = vcmask 97280   ;;  %s2458_s9 = scalar_lea.vmem %s2525_s6, %s2452_s29  ;;  %vm1521_vm12 = vcmask 64512  }
  0x10   : > { %v2165_v5 = vsub.f32 %v434_v2, %v2160_v3  ;;  %v422_v8 = vld [vmem:[%s2170_s12 + $0x40] sm:$0x1f]  ;;  %v420_v9 = vld [vmem:[%s2170_s12 + $0x30] sm:$0xff]  ;;  %v423_v20 = vld [vmem:[%s2170_s12 + $0x48] sm:$0x1f]  ;;  %v2204_v23 = vsub.f32 %v437_v4, %v2172_v6  ;;  %v2286_v61 = vsub.f32 %v440_v29, %v2240_v40  ;;  %s392_s13 = scalar_lea.vmem %s2521_s2, %s2452_s29  ;;  %s412_s16 = scalar_lea.vmem %s2526_s7, %s2452_s29 }
  0x11   : > { %v418_v10 = vld [vmem:[%s2170_s12 + $0x20] sm:$0xff]  ;;  %v447_v11 = vsel %vm445_vm1, %v422_v8, 0  ;;  %v2181_v12 = vand.u32 4294901760, %v420_v9  ;;  %v416_v14 = vld [vmem:[%s2170_s12 + $0x10] sm:$0xff]  ;;  %v450_v24 = vsel %vm445_vm1, %v423_v20, 0  ;;  %v421_v25 = vld [vmem:[%s2170_s12 + $0x38] sm:$0xff] }
  0x12   : > { %v2183_v13 = vand.u32 4294901760, %v418_v10  ;;  %v414_v15 = vld [vmem:[%s2170_s12] sm:$0xff]  ;;  %v2188_v16 = vand.u32 4294901760, %v2165_v5  ;;  %v2190_v17 = vand.u32 4294901760, %v447_v11  ;;  %v2192_v18 = vand.u32 4294901760, %v416_v14  ;;  %v419_v34 = vld [vmem:[%s2170_s12 + $0x28] sm:$0xff] }
  0x13   : > { %v2194_v19 = vand.u32 4294901760, %v414_v15  ;;  %v2198_v21 = vsub.f32 %v420_v9, %v2181_v12  ;;  %v2224_v33 = vand.u32 4294901760, %v450_v24  ;;  %v2231_v37 = vand.u32 4294901760, %v421_v25  ;;  %v417_v45 = vld [vmem:[%s2170_s12 + $0x18] sm:$0xff]  ;;  %v415_v50 = vld [vmem:[%s2170_s12 + $0x8] sm:$0xff] }
  0x14   : > { %v2201_v22 = vsub.f32 %v418_v10, %v2183_v13  ;;  %464 = vmatpush.msra.mxu0 %v2190_v17  ;;  %v2210_v26 = vsub.f32 %v447_v11, %v2190_v17  ;;  %623 = vmatpush.msra.mxu3 %v2190_v17  ;;  %v2214_v27 = vsub.f32 %v416_v14, %v2192_v18  ;;  %v2249_v44 = vand.u32 4294901760, %v419_v34 }
  0x15   : > { %v2217_v28 = vsub.f32 %v414_v15, %v2194_v19  ;;  %v476_v30 = vsub.f32 %v2165_v5, %v2188_v16  ;;  %v525_v31 = vand.u32 4294901760, %v2198_v21  ;;  %v2238_v39 = vsub.f32 %v450_v24, %v2224_v33 }
  0x16   : > { %v531_v32 = vand.u32 4294901760, %v2201_v22  ;;  %466 = vmatpush.msra.mxu0 %v2181_v12  ;;  %577 = vmatpush.msra.mxu2 %v2210_v26  ;;  %v519_v35 = vand.u32 4294901760, %v2210_v26  ;;  %v537_v36 = vand.u32 4294901760, %v2214_v27  ;;  %v2256_v47 = vand.u32 4294901760, %v2204_v23 }
  0x17   : > { %625 = vmatpush.msra.mxu3 %v2181_v12  ;;  %v526_v38 = vsub.f32 %v2198_v21, %v525_v31  ;;  %v543_v43 = vand.u32 4294901760, %v2217_v28  ;;  %v2253_v46 = vand.u32 4294901760, %v476_v30  ;;  %v810_v48 = vand.u32 4294901760, %v2238_v39 }
  0x18   : > { %468 = vmatpush.msra.mxu0 %v2183_v13  ;;  %580 = vmatpush.msra.mxu2 %v2198_v21  ;;  %v520_v41 = vsub.f32 %v2210_v26, %v519_v35  ;;  %v532_v42 = vsub.f32 %v2201_v22, %v531_v32  ;;  %v2260_v49 = vsub.f32 %v421_v25, %v2231_v37  ;;  %v2279_v58 = vand.u32 4294901760, %v417_v45 }
  0x19   : > { %627 = vmatpush.msra.mxu3 %v2183_v13  ;;  %v527_v52 = vand.u32 4294901760, %v526_v38  ;;  %v538_v53 = vsub.f32 %v2214_v27, %v537_v36  ;;  %v811_v54 = vsub.f32 %v2238_v39, %v810_v48  ;;  %v2277_v57 = vsub.f32 %v419_v34, %v2249_v44 }
  0x1a   : > { %470 = vmatpush.msra.mxu0 %v2192_v18  ;;  %v521_v51 = vand.u32 4294901760, %v520_v41  ;;  %583 = vmatpush.msra.mxu2 %v2201_v22  ;;  %v816_v55 = vand.u32 4294901760, %v2260_v49  ;;  %v533_v59 = vand.u32 4294901760, %v532_v42  ;;  %v544_v60 = vsub.f32 %v2217_v28, %v543_v43 }
  0x1b   : > { %629 = vmatpush.msra.mxu3 %v2192_v18  ;;  %v2288_v62 = vand.u32 4294901760, %v415_v50  ;;  %v484_v63 = vsub.f32 %v2204_v23, %v2256_v47  ;;  %v822_v1 = vand.u32 4294901760, %v2277_v57  ;;  %v2299_v2 = vsub.f32 %v417_v45, %v2279_v58  ;;  %v427_v45 = vld [vmem:[%s2397_s20 + $0x18] sm:$0xf] }
  0x1c   : > { %472 = vmatpush.msra.mxu0 %v2194_v19  ;;  %522 = vmatpush.msra.mxu1 %v521_v51  ;;  %v817_v0 = vsub.f32 %v2260_v49, %v816_v55  ;;  %v539_v4 = vand.u32 4294901760, %v538_v53  ;;  %v812_v7 = vand.u32 4294901760, %v811_v54  ;;  %v443_v8 = vsel %vm432_vm0, %v431_v56, 0 }
  0x1d   : > { %478 = vmatmul.f32.vlgmr.msra.gmra.mxu0 %v2253_v46  ;;  %586 = vmatpush.msra.mxu2 %v2214_v27  ;;  %v2304_v9 = vsub.f32 %v415_v50, %v2288_v62  ;;  %v828_v10 = vand.u32 4294901760, %v2299_v2  ;;  %v545_v11 = vand.u32 4294901760, %v544_v60  ;;  %v2310_v15 = vand.u32 4294901760, %v484_v63 }
  0x1e   : > { %528 = vmatpush.msra.mxu1 %v527_v52  ;;  %631 = vmatpush.msra.mxu3 %v2194_v19  ;;  %v818_v14 = vand.u32 4294901760, %v817_v0  ;;  %v2314_v20 = vand.u32 4294901760, %v2286_v61  ;;  %v2316_v24 = vand.u32 4294901760, %v443_v8  ;;  %v823_v25 = vsub.f32 %v2277_v57, %v822_v1 }
  0x1f   : > { %589 = vmatpush.msra.mxu2 %v2217_v28  ;;  %635 = vmatmul.f32.vlgmr.msra.gmra.mxu3 %v2188_v16  ;;  %v834_v26 = vand.u32 4294901760, %v2304_v9  ;;  %v829_v29 = vsub.f32 %v2299_v2, %v828_v10 }
  0x20   : > { %534 = vmatpush.msra.mxu1 %v533_v59  ;;  %592 = vmatmul.f32.vlgmr.msra.gmra.mxu2 %v2165_v5  ;;  %v492_v30 = vsub.f32 %v2286_v61, %v2314_v20  ;;  %v2333_v34 = vsub.f32 %v443_v8, %v2316_v24 }
  0x21   : > { %755 = vmatpush.msrb.mxu2 %v2224_v33  ;;  %671 = vmatpush.msrb.mxu0 %v519_v35  ;;  %v824_v35 = vand.u32 4294901760, %v823_v25  ;;  %v835_v21 = vsub.f32 %v2304_v9, %v834_v26 }
  0x22   : > { %540 = vmatpush.msra.mxu1 %v539_v4  ;;  %813 = vmatpush.msrb.mxu3 %v812_v7  ;;  %v2343_v38 = vand.u32 4294901760, %v492_v30  ;;  %v2346_v41 = vand.u32 4294901760, %v2333_v34 }
  0x23   : > { %757 = vmatpush.msrb.mxu2 %v2231_v37  ;;  %675 = vmatpush.msrb.mxu0 %v525_v31  ;;  %v830_v31 = vand.u32 4294901760, %v829_v29 }
  0x24   : > { %546 = vmatpush.msra.mxu1 %v545_v11  ;;  %819 = vmatpush.msrb.mxu3 %v818_v14 }
  0x25   : > { %486 = vmatmul.f32.gmra.mxu0 %v2310_v15  ;;  %548 = vmatmul.f32.vlgmr.msra.gmra.mxu1 %v2160_v3 }
  0x26   : > { %717 = vmatpush.msrb.mxu1 %v2190_v17  ;;  %759 = vmatpush.msrb.mxu2 %v2249_v44  ;;  %v836_v17 = vand.u32 4294901760, %v835_v21 }
  0x27   : > { %641 = vmatmul.f32.gmra.mxu3 %v2256_v47  ;;  %679 = vmatpush.msrb.mxu0 %v531_v32 }
  0x28   : > { %597 = vmatmul.f32.gmra.mxu2 %v2204_v23  ;;  %719 = vmatpush.msrb.mxu1 %v2181_v12  ;;  %v500_v12 = vsub.f32 %v2333_v34, %v2346_v41 }
  0x29   : > { %825 = vmatpush.msrb.mxu3 %v824_v35  ;;  %683 = vmatpush.msrb.mxu0 %v537_v36  ;;  %v424_v36 = vld [vmem:[%s2397_s20] sm:$0xff] }
  0x2a   : > { %721 = vmatpush.msrb.mxu1 %v2183_v13  ;;  %761 = vmatpush.msrb.mxu2 %v2279_v58  ;;  %v501_v13 = vand.u32 4294901760, %v500_v12 }
  0x2b   : > { %687 = vmatpush.msrb.mxu0 %v543_v43  ;;  %831 = vmatpush.msrb.mxu3 %v830_v31 }
  0x2c   : > { %723 = vmatpush.msrb.mxu1 %v2192_v18  ;;  %763 = vmatpush.msrb.mxu2 %v2288_v62  ;;  %v426_v18 = vld [vmem:[%s2397_s20 + $0x10] sm:$0xf] }
  0x2d   : > { %494 = vmatmul.f32.gmra.mxu0 %v2343_v38  ;;  %552 = vmatmul.f32.gmra.mxu1 %v2172_v6 }
  0x2e   : > { %837 = vmatpush.msrb.mxu3 %v836_v17  ;;  %725 = vmatpush.msrb.mxu1 %v2194_v19  ;;  %v1045_v19 = vsel %vm1043_vm2, %v426_v18, 0 }
  0x2f   : > { %647 = vmatmul.f32.gmra.mxu3 %v2314_v20  ;;  %962 = vmatpush.msra.mxu2 %v810_v48  ;;  %v1064_v22 = vand.u32 4294901760, %v1045_v19  ;;  %v1048_v48 = vsel %vm1043_vm2, %v427_v45, 0 }
  0x30   : > { %602 = vmatmul.f32.gmra.mxu2 %v2286_v61  ;;  %868 = vmatpush.msra.mxu0 %v2238_v39 }
  0x31   : > { %1008 = vmatpush.msra.mxu3 %v2224_v33  ;;  %914 = vmatpush.msra.mxu1 %v2224_v33  ;;  %v1100_v27 = vsub.f32 %v1045_v19, %v1064_v22 }
  0x32   : > { %966 = vmatpush.msra.mxu2 %v816_v55  ;;  %871 = vmatpush.msra.mxu0 %v2260_v49  ;;  %v1254_v49 = vand.u32 4294901760, %v1048_v48 }
  0x33   : > { %1010 = vmatpush.msra.mxu3 %v2231_v37  ;;  %916 = vmatpush.msra.mxu1 %v2231_v37  ;;  %v1101_v28 = vand.u32 4294901760, %v1100_v27  ;;  %v1066_v37 = vand.u32 4294901760, %v424_v36 }
  0x34   : > { %970 = vmatpush.msra.mxu2 %v822_v1  ;;  %874 = vmatpush.msra.mxu0 %v2277_v57 }
  0x35   : > { %502 = vmatmul.f32.gmra.mxu0 %v501_v13  ;;  %556 = vmatmul.f32.gmra.mxu1 %v2240_v40  ;;  %v1102_v32 = vsub.f32 %v1100_v27, %v1101_v28  ;;  %v1106_v39 = vsub.f32 %v424_v36, %v1066_v37 }
  0x36   : > { %1012 = vmatpush.msra.mxu3 %v2249_v44  ;;  %918 = vmatpush.msra.mxu1 %v2249_v44 }
  0x37   : > { %653 = vmatmul.f32.gmra.mxu3 %v2346_v41  ;;  %877 = vmatpush.msra.mxu0 %v2299_v2  ;;  %v1103_v33 = vand.u32 4294901760, %v1102_v32  ;;  %v1107_v42 = vand.u32 4294901760, %v1106_v39 }
  0x38   : > { %607 = vmatmul.f32.gmra.mxu2 %v2333_v34  ;;  %1014 = vmatpush.msra.mxu3 %v2279_v58 }
  0x39   : > { %880 = vmatpush.msra.mxu0 %v2304_v9  ;;  %974 = vmatpush.msra.mxu2 %v828_v10  ;;  %v1108_v43 = vsub.f32 %v1106_v39, %v1107_v42 }
  0x3a   : > { %920 = vmatpush.msra.mxu1 %v2279_v58  ;;  %1016 = vmatpush.msra.mxu3 %v2288_v62 }
  0x3b   : > { %978 = vmatpush.msra.mxu2 %v834_v26  ;;  %v1109_v44 = vand.u32 4294901760, %v1108_v43 }
  0x3c   : > { %922 = vmatpush.msra.mxu1 %v2288_v62 }
  0x3d   : > { %560 = vmatmul.f32.gmra.mxu1 %v2316_v24  ;;  %689 = vmatmul.f32.vlgmr.msrb.gmra.mxu0 %v2160_v3 }
  0x3e   : > { %1065 = vmatpush.msrb.mxu0 %v1064_v22 }
  0x3f   : > { %839 = vmatmul.f32.vlgmr.msrb.gmra.mxu3 %v2160_v3 }
  0x40   : > { %769 = vmatmul.f32.vlgmr.msrb.gmra.mxu2 %v2253_v46  ;;  %1166 = vmatpush.msrb.mxu3 %v1064_v22  ;;  %v1034_v46 = vld [vmem:[%s2523_s4] sm:$0xff] }
  0x41   : > { %1136 = vmatpush.msrb.mxu2 %v1100_v27  ;;  %1067 = vmatpush.msrb.mxu0 %v1066_v37  ;;  %v1038_v50 = vsel %vm1036_vm3, %v1034_v46, 0 }
  0x42   : > { %1168 = vmatpush.msrb.mxu3 %v1066_v37  ;;  %v1068_v54 = vand.u32 4294901760, %v1038_v50 }
  0x43   : > { %1139 = vmatpush.msrb.mxu2 %v1106_v39 }
  0x44   : > { %v1069_v58 = vsub.f32 %v1038_v50, %v1068_v54 }
  0x45   : > { %693 = vmatmul.f32.gmra.mxu0 %v2172_v6  ;;  %727 = vmatmul.f32.vlgmr.msrb.gmra.mxu1 %v2160_v3 }
  0x46   : > { %1104 = vmatpush.msrb.mxu1 %v1103_v33  ;;  %v1070_v60 = vand.u32 4294901760, %v1069_v58 }
  0x47   : > { %843 = vmatmul.f32.gmra.mxu3 %v2172_v6 }
  0x48   : > { %777 = vmatmul.f32.gmra.mxu2 %v2310_v15  ;;  %1110 = vmatpush.msrb.mxu1 %v1109_v44  ;;  %v1071_v63 = vsub.f32 %v1069_v58, %v1070_v60 }
  0x4d   : > { %697 = vmatmul.f32.gmra.mxu0 %v2240_v40  ;;  %731 = vmatmul.f32.gmra.mxu1 %v2172_v6 }
  0x4f   : > { %847 = vmatmul.f32.gmra.mxu3 %v2240_v40 }
  0x50   : > { %785 = vmatmul.f32.gmra.mxu2 %v2343_v38 }
  0x55   : > { %701 = vmatmul.f32.gmra.mxu0 %v2316_v24  ;;  %735 = vmatmul.f32.gmra.mxu1 %v2240_v40 }
  0x57   : > { %851 = vmatmul.f32.gmra.mxu3 %v2316_v24 }
  0x58   : > { %793 = vmatmul.f32.gmra.mxu2 %v501_v13 }
  0x5d   : > { %739 = vmatmul.f32.gmra.mxu1 %v2316_v24  ;;  %883 = vmatmul.f32.vlgmr.msra.gmra.mxu0 %v2165_v5  ;;  %v425_v5 = vld [vmem:[%s2397_s20 + $0x8] sm:$0xff] }
  0x5e   : > { %1199 = vmatpush.msra.mxu0 %v1101_v28  ;;  %v1256_v51 = vand.u32 4294901760, %v425_v5 }
  0x5f   : > { %1018 = vmatmul.f32.vlgmr.msra.gmra.mxu3 %v2160_v3 }
  0x60   : > { %980 = vmatmul.f32.vlgmr.msra.gmra.mxu2 %v2160_v3  ;;  %1203 = vmatpush.msra.mxu0 %v1107_v42  ;;  %v1290_v3 = vsub.f32 %v1048_v48, %v1254_v49  ;;  %v1296_v53 = vsub.f32 %v425_v5, %v1256_v51 }
  0x61   : > { %1255 = vmatpush.msra.mxu2 %v1254_v49 }
  0x62   : > { %v1291_v52 = vand.u32 4294901760, %v1290_v3 }
  0x63   : > { %1257 = vmatpush.msra.mxu2 %v1256_v51 }
  0x64   : > { %v1292_v55 = vsub.f32 %v1290_v3, %v1291_v52 }
  0x65   : > { %888 = vmatmul.f32.gmra.mxu0 %v2204_v23  ;;  %926 = vmatmul.f32.vlgmr.msra.gmra.mxu1 %v2188_v16  ;;  %v1297_v23 = vand.u32 4294901760, %v1296_v53  ;;  %v1035_v16 = vld [vmem:[%s2523_s4 + $0x8] sm:$0xff] }
  0x66   : > { %1228 = vmatpush.msra.mxu1 %v1064_v22  ;;  %v1293_v56 = vand.u32 4294901760, %v1292_v55 }
  0x67   : > { %1022 = vmatmul.f32.gmra.mxu3 %v2172_v6  ;;  %v1298_v57 = vsub.f32 %v1296_v53, %v1297_v23 }
  0x68   : > { %984 = vmatmul.f32.gmra.mxu2 %v2172_v6  ;;  %1230 = vmatpush.msra.mxu1 %v1066_v37  ;;  %v1041_v6 = vsel %vm1036_vm3, %v1035_v16, 0 }
  0x69   : > { %1294 = vmatpush.msra.mxu3 %v1293_v56  ;;  %v1299_v59 = vand.u32 4294901760, %v1298_v57  ;;  %v1076_v62 = vand.u32 4294901760, %v1041_v6 }
  0x6b   : > { %1300 = vmatpush.msra.mxu3 %v1299_v59 }
  0x6d   : > { %893 = vmatmul.f32.gmra.mxu0 %v2286_v61  ;;  %932 = vmatmul.f32.gmra.mxu1 %v2256_v47  ;;  %v1077_v61 = vsub.f32 %v1041_v6, %v1076_v62  ;;  %v1072_v47 = vand.u32 4294901760, %v1071_v63 }
  0x6f   : > { %1026 = vmatmul.f32.gmra.mxu3 %v2240_v40  ;;  %v1078_v0 = vand.u32 4294901760, %v1077_v61 }
  0x70   : > { %988 = vmatmul.f32.gmra.mxu2 %v2240_v40 }
  0x71   : > { %v1079_v1 = vsub.f32 %v1077_v61, %v1078_v0 }
  0x73   : > { %v1080_v40 = vand.u32 4294901760, %v1079_v1 }
  0x75   : > { %898 = vmatmul.f32.gmra.mxu0 %v2333_v34  ;;  %938 = vmatmul.f32.gmra.mxu1 %v2314_v20 }
  0x77   : > { %1030 = vmatmul.f32.gmra.mxu3 %v2316_v24 }
  0x78   : > { %992 = vmatmul.f32.gmra.mxu2 %v2316_v24 }
  0x7d   : > { %944 = vmatmul.f32.gmra.mxu1 %v2346_v41  ;;  %1073 = vmatmul.f32.vlgmr.msrb.gmra.mxu0 %v1072_v47 }
  0x7e   : > { %1326 = vmatpush.msrb.mxu0 %v1290_v3 }
  0x7f   : > { %1172 = vmatmul.f32.vlgmr.msrb.gmra.mxu3 %v1070_v60 }
  0x80   : > { %1142 = vmatmul.f32.vlgmr.msrb.gmra.mxu2 %v1069_v58  ;;  %1418 = vmatpush.msrb.mxu3 %v1254_v49 }
  0x81   : > { %1389 = vmatpush.msrb.mxu2 %v1291_v52  ;;  %1329 = vmatpush.msrb.mxu0 %v1296_v53 }
  0x82   : > { %1420 = vmatpush.msrb.mxu3 %v1256_v51 }
  0x83   : > { %1393 = vmatpush.msrb.mxu2 %v1297_v23 }
  0x85   : > { %1081 = vmatmul.f32.gmra.mxu0 %v1080_v40  ;;  %1112 = vmatmul.f32.vlgmr.msrb.gmra.mxu1 %v1068_v54 }
  0x86   : > { %1356 = vmatpush.msrb.mxu1 %v1254_v49 }
  0x87   : > { %1178 = vmatmul.f32.gmra.mxu3 %v1078_v0 }
  0x88   : > { %1147 = vmatmul.f32.gmra.mxu2 %v1077_v61  ;;  %1358 = vmatpush.msrb.mxu1 %v1256_v51 }
  0x8d   : > { %1116 = vmatmul.f32.gmra.mxu1 %v1076_v62  ;;  %1205 = vmatmul.f32.vlgmr.msra.gmra.mxu0 %v1068_v54 }
  0x8f   : > { %1302 = vmatmul.f32.vlgmr.msra.gmra.mxu3 %v1068_v54 }
  0x90   : > { %1263 = vmatmul.f32.vlgmr.msra.gmra.mxu2 %v1072_v47 }
  0x95   : > { %1209 = vmatmul.f32.gmra.mxu0 %v1076_v62  ;;  %1232 = vmatmul.f32.vlgmr.msra.gmra.mxu1 %v1068_v54 }
  0x97   : > { %1306 = vmatmul.f32.gmra.mxu3 %v1076_v62 }
  0x98   : > { %1271 = vmatmul.f32.gmra.mxu2 %v1080_v40 }
  0x9a   : > { %v479_v2 = vpop.f32.mrf.mxu0 }
  0x9d   : > { %1236 = vmatmul.f32.gmra.mxu1 %v1076_v62  ;;  %1332 = vmatmul.f32.vlgmr.msrb.gmra.mxu0 %v1069_v58 }
  0x9f   : > { %1422 = vmatmul.f32.vlgmr.msrb.gmra.mxu3 %v1068_v54 }
  0xa0   : > { %1395 = vmatmul.f32.vlgmr.msrb.gmra.mxu2 %v1068_v54 }
  0xa2   : > { %v487_v4 = vpop.f32.mrf.mxu0  ;;  %v549_v7 = vpop.f32.mrf.mxu1 }
  0xa3   : > { %v593_v8 = vpop.f32.mrf.mxu2  ;;  %v636_v9 = vpop.f32.mrf.mxu3  ;;  %v550_v46 = vadd.f32 %v549_v7, %v479_v2 }
  0xa5   : > { %1337 = vmatmul.f32.gmra.mxu0 %v1077_v61  ;;  %1362 = vmatmul.f32.vlgmr.msrb.gmra.mxu1 %v1070_v60  ;;  %v594_v54 = vadd.f32 %v593_v8, %v550_v46 }
  0xa7   : > { %1426 = vmatmul.f32.gmra.mxu3 %v1076_v62  ;;  %v637_v23 = vadd.f32 %v636_v9, %v594_v54 }
  0xa8   : > { %1399 = vmatmul.f32.gmra.mxu2 %v1076_v62 }
  0xaa   : > { %v495_v10 = vpop.f32.mrf.mxu0  ;;  %v553_v11 = vpop.f32.mrf.mxu1 }
  0xab   : > { %v598_v14 = vpop.f32.mrf.mxu2  ;;  %v642_v15 = vpop.f32.mrf.mxu3  ;;  %v554_v12 = vadd.f32 %v553_v11, %v487_v4 }
  0xad   : > { %1368 = vmatmul.f32.gmra.mxu1 %v1078_v0  ;;  %v599_v22 = vadd.f32 %v598_v14, %v554_v12 }
  0xaf   : > { %v643_v32 = vadd.f32 %v642_v15, %v599_v22 }
  0xb2   : > { %v503_v20 = vpop.f32.mrf.mxu0  ;;  %v557_v24 = vpop.f32.mrf.mxu1 }
  0xb3   : > { %v558_v25 = vadd.f32 %v557_v24, %v495_v10  ;;  %v603_v26 = vpop.f32.mrf.mxu2  ;;  %v648_v29 = vpop.f32.mrf.mxu3 }
  0xb5   : > { %v604_v30 = vadd.f32 %v603_v26, %v558_v25 }
  0xb7   : > { %v649_v34 = vadd.f32 %v648_v29, %v604_v30 }
  0xba   : > { %v561_v35 = vpop.f32.mrf.mxu1  ;;  %v690_v21 = vpop.f32.mrf.mxu0 }
  0xbb   : > { %v562_v31 = vadd.f32 %v561_v35, %v503_v20  ;;  %v608_v38 = vpop.f32.mrf.mxu2  ;;  %v654_v41 = vpop.f32.mrf.mxu3  ;;  %v691_v59 = vadd.f32 %v690_v21, %v637_v23 }
  0xbd   : > { %v609_v17 = vadd.f32 %v608_v38, %v562_v31 }
  0xbf   : > { %v655_v13 = vadd.f32 %v654_v41, %v609_v17 }
  0xc2   : > { %v694_v18 = vpop.f32.mrf.mxu0  ;;  %v728_v19 = vpop.f32.mrf.mxu1 }
  0xc3   : > { %v2441_v27 = vpop.f32.mrf.mxu2  ;;  %v2443_v28 = vpop.f32.mrf.mxu3  ;;  %v695_v33 = vadd.f32 %v694_v18, %v643_v32  ;;  %v729_v63 = vadd.f32 %v728_v19, %v691_v59 }
  0xc4   : > { %v841_v32 = vadd.f32 %v2443_v28, %v2441_v27 }
  0xca   : > { %v698_v36 = vpop.f32.mrf.mxu0  ;;  %v732_v37 = vpop.f32.mrf.mxu1 }
  0xcb   : > { %v699_v39 = vadd.f32 %v698_v36, %v649_v34  ;;  %v733_v42 = vadd.f32 %v732_v37, %v695_v33  ;;  %v778_v43 = vpop.f32.mrf.mxu2  ;;  %v844_v44 = vpop.f32.mrf.mxu3 }
  0xcc   : > { %v845_v11 = vadd.f32 %v844_v44, %v778_v43 }
  0xcd   : > { %v2010_v45 = vmul.f32 -1.442695, %v733_v42 }
  0xcf   : > { %2045 = vpow2.f32 %v2010_v45 }
  0xd2   : > { %v702_v48 = vpop.f32.mrf.mxu0  ;;  %v736_v49 = vpop.f32.mrf.mxu1 }
  0xd3   : > { %v703_v5 = vadd.f32 %v702_v48, %v655_v13  ;;  %v2445_v50 = vadd.f32 %v736_v49, %v699_v39  ;;  %v786_v3 = vpop.f32.mrf.mxu2  ;;  %v848_v51 = vpop.f32.mrf.mxu3 }
  0xd4   : > { %v849_v52 = vadd.f32 %v848_v51, %v786_v3 }
  0xd5   : > { %v2046_v53 = vpop.eup %2045 }
  0xd6   : > { %v1442_v55 = vadd.f32 1.0, %v2046_v53 }
  0xd8   : > { %2047 = vrcp.f32 %v1442_v55  ;;  %v1455_v0 = vand.u32 2147483648, %v1442_v55  ;;  %v1453_v8 = vand.u32 2147483647, %v1442_v55  ;;  %vm1449_vm5 = vweird.f32 %v1442_v55 }
  0xd9   : > { %2049 = vtanh.f32 %v729_v63 }
  0xda   : > { %v740_v16 = vpop.f32.mrf.mxu1  ;;  %v884_v56 = vpop.f32.mrf.mxu0  ;;  %v1456_v10 = vor.u32 1.1754944e-38, %v1455_v0  ;;  %vm1454_vm7 = vcmp.eq.f32.partialorder %v1453_v8, 8.507059e+37 }
  0xdb   : > { %v2447_v57 = vadd.f32 %v740_v16, %v703_v5  ;;  %v794_v58 = vpop.f32.mrf.mxu2  ;;  %v852_v6 = vpop.f32.mrf.mxu3  ;;  %v885_v36 = vadd.f32 %v884_v56, %v841_v32 }
  0xdc   : > { %v2449_v60 = vadd.f32 %v852_v6, %v794_v58 }
  0xde   : > { %v2048_v62 = vpop.eup %2047 }
  0xdf   : > { %v1445_v61 = vmul.f32 %v2048_v62, %v1442_v55  ;;  %vm1450_vm4 = vweird.f32 %v2048_v62  ;;  %v2050_v15 = vpop.eup %2049 }
  0xe0   : > { %vm1451_vm6 = vmor %vm1449_vm5, %vm1450_vm4 }
  0xe1   : > { %v1446_v47 = vsub.f32 1.0, %v1445_v61 }
  0xe2   : > { %v889_v1 = vpop.f32.mrf.mxu0  ;;  %v927_v40 = vpop.f32.mrf.mxu1 }
  0xe3   : > { %v1447_v2 = vmul.f32 %v2048_v62, %v1446_v47  ;;  %v981_v4 = vpop.f32.mrf.mxu2  ;;  %v1019_v7 = vpop.f32.mrf.mxu3  ;;  %v890_v24 = vadd.f32 %v889_v1, %v845_v11  ;;  %v928_v39 = vadd.f32 %v927_v40, %v885_v36 }
  0xe5   : > { %v1448_v9 = vadd.f32 %v2048_v62, %v1447_v2  ;;  %v982_v48 = vadd.f32 %v981_v4, %v928_v39 }
  0xe7   : > { %v1452_v14 = vsel %vm1451_vm6, %v2048_v62, %v1448_v9  ;;  %v1020_v5 = vadd.f32 %v1019_v7, %v982_v48 }
  0xe8   : > { %v1457_v20 = vsel %vm1454_vm7, %v1456_v10, %v1452_v14 }
  0xe9   : > { %v1474_v25 = vmul.f32 %v2050_v15, %v1457_v20 }
  0xea   : > { %v894_v26 = vpop.f32.mrf.mxu0  ;;  %v933_v29 = vpop.f32.mrf.mxu1 }
  0xeb   : > { %v895_v30 = vadd.f32 %v894_v26, %v849_v52  ;;  %v934_v34 = vadd.f32 %v933_v29, %v890_v24  ;;  %v985_v35 = vpop.f32.mrf.mxu2  ;;  %v1023_v21 = vpop.f32.mrf.mxu3  ;;  %1476 = vst [vmem:[%s2458_s9] sm:$0x3f] %v1474_v25 }
  0xed   : > { %v986_v31 = vadd.f32 %v985_v35, %v934_v34 }
  0xef   : > { %v1024_v38 = vadd.f32 %v1023_v21, %v986_v31 }
  0xf1   : > { %v2011_v41 = vmul.f32 -1.442695, %v1024_v38 }
  0xf2   : > { %v2461_v17 = vpop.f32.mrf.mxu0  ;;  %v939_v12 = vpop.f32.mrf.mxu1 }
  0xf3   : > { %2051 = vpow2.f32 %v2011_v41  ;;  %v940_v13 = vadd.f32 %v939_v12, %v895_v30  ;;  %v989_v18 = vpop.f32.mrf.mxu2  ;;  %v1027_v19 = vpop.f32.mrf.mxu3  ;;  %v900_v31 = vadd.f32 %v2461_v17, %v2449_v60  ;;  %v1520_v41 = vld [vmem:[%s2524_s5] sm:$0xff] }
  0xf4   : > { %v1523_v32 = vsel %vm1521_vm12, %v1520_v41, 0 }
  0xf5   : > { %v990_v22 = vadd.f32 %v989_v18, %v940_v13  ;;  %v2479_v48 = vand.u32 4294901760, %v1523_v32 }
  0xf7   : > { %v2465_v33 = vadd.f32 %v1027_v19, %v990_v22 }
  0xf9   : > { %v2052_v37 = vpop.eup %2051 }
  0xfa   : > { %v1443_v42 = vadd.f32 1.0, %v2052_v37  ;;  %v945_v43 = vpop.f32.mrf.mxu1  ;;  %v1074_v44 = vpop.f32.mrf.mxu0 }
  0xfb   : > { %v2467_v45 = vpop.f32.mrf.mxu2  ;;  %v2469_v46 = vpop.f32.mrf.mxu3  ;;  %v946_v13 = vadd.f32 %v945_v43, %v900_v31 }
  0xfc   : > { %2053 = vrcp.f32 %v1443_v42  ;;  %v1470_v54 = vand.u32 2147483648, %v1443_v42  ;;  %v1468_v23 = vand.u32 2147483647, %v1443_v42  ;;  %vm1464_vm9 = vweird.f32 %v1443_v42 }
  0xfd   : > { %2055 = vtanh.f32 %v1020_v5  ;;  %v994_v39 = vadd.f32 %v2467_v45, %v946_v13 }
  0xfe   : > { %v1471_v56 = vor.u32 1.1754944e-38, %v1470_v54  ;;  %vm1469_vm11 = vcmp.eq.f32.partialorder %v1468_v23, 8.507059e+37 }
  0xff   : > { %v1032_v5 = vadd.f32 %v2469_v46, %v994_v39 }
 0x102   : > { %v2054_v49 = vpop.eup %2053  ;;  %v1082_v3 = vpop.f32.mrf.mxu0 }
 0x103   : > { %v1113_v51 = vpop.f32.mrf.mxu1  ;;  %v1460_v52 = vmul.f32 %v2054_v49, %v1443_v42  ;;  %v1143_v27 = vpop.f32.mrf.mxu2  ;;  %vm1465_vm8 = vweird.f32 %v2054_v49 }
 0x104   : > { %v1173_v28 = vpop.f32.mrf.mxu3  ;;  %vm1466_vm10 = vmor %vm1464_vm9, %vm1465_vm8  ;;  %v2056_v61 = vpop.eup %2055  ;;  %v1114_v29 = vadd.f32 %v1113_v51, %v1074_v44 }
 0x105   : > { %v1461_v53 = vsub.f32 1.0, %v1460_v52  ;;  %v2484_v52 = vsub.f32 %v1523_v32, %v2479_v48 }
 0x106   : > { %v1144_v21 = vadd.f32 %v1143_v27, %v1114_v29 }
 0x107   : > { %v1462_v55 = vmul.f32 %v2054_v49, %v1461_v53  ;;  %v2487_v23 = vand.u32 4294901760, %v2484_v52 }
 0x109   : > { %v1463_v16 = vadd.f32 %v2054_v49, %v1462_v55 }
 0x10a   : > { %v1206_v6 = vpop.f32.mrf.mxu0 }
 0x10b   : > { %v1117_v58 = vpop.f32.mrf.mxu1  ;;  %v1148_v59 = vpop.f32.mrf.mxu2  ;;  %v1467_v63 = vsel %vm1466_vm10, %v2054_v49, %v1463_v16 }
 0x10c   : > { %v1179_v62 = vpop.f32.mrf.mxu3  ;;  %v1472_v47 = vsel %vm1469_vm11, %v1471_v56, %v1467_v63  ;;  %v1118_v1 = vadd.f32 %v1117_v58, %v1082_v3 }
 0x10d   : > { %v1475_v0 = vmul.f32 %v2056_v61, %v1472_v47 }
 0x10e   : > { %v1149_v4 = vadd.f32 %v1148_v59, %v1118_v1  ;;  %v1545_v59 = vsub.f32 %v2484_v52, %v2487_v23 }
 0x10f   : > { %1477 = vst [vmem:[%s2458_s9 + $0x8] sm:$0x3f] %v1475_v0 }
 0x110   : > { %v1180_v9 = vadd.f32 %v1179_v62, %v1149_v4 }
 0x112   : > { %v1210_v40 = vpop.f32.mrf.mxu0 }
 0x113   : > { %v1233_v2 = vpop.f32.mrf.mxu1  ;;  %v1264_v7 = vpop.f32.mrf.mxu2  ;;  %v1211_v10 = vadd.f32 %v1210_v40, %v1180_v9 }
 0x114   : > { %v1303_v8 = vpop.f32.mrf.mxu3 }
 0x115   : > { %v1304_v54 = vadd.f32 %v1303_v8, %v1264_v7 }
 0x11a   : > { %v1333_v24 = vpop.f32.mrf.mxu0 }
 0x11b   : > { %v1237_v11 = vpop.f32.mrf.mxu1  ;;  %v1272_v15 = vpop.f32.mrf.mxu2  ;;  %v1334_v56 = vadd.f32 %v1333_v24, %v1304_v54 }
 0x11c   : > { %v1238_v14 = vadd.f32 %v1237_v11, %v1211_v10  ;;  %v1307_v20 = vpop.f32.mrf.mxu3 }
 0x11d   : > { %v1308_v18 = vadd.f32 %v1307_v20, %v1272_v15 }
 0x11e   : > { %v1432_v25 = vadd.f32 %v1238_v14, %v2447_v57  ;;  %v1174_v57 = vadd.f32 %v1173_v28, %v1144_v21 }
 0x120   : > { %v2012_v26 = vmul.f32 -1.442695, %v1432_v25  ;;  %v1207_v36 = vadd.f32 %v1206_v6, %v1174_v57 }
 0x122   : > { %2057 = vpow2.f32 %v2012_v26  ;;  %v1338_v38 = vpop.f32.mrf.mxu0  ;;  %v1234_v17 = vadd.f32 %v1233_v2, %v1207_v36  ;;  %v1546_v2 = vand.u32 4294901760, %v1545_v59 }
 0x123   : > { %v1363_v30 = vpop.f32.mrf.mxu1  ;;  %v1396_v34 = vpop.f32.mrf.mxu2  ;;  %v1339_v22 = vadd.f32 %v1338_v38, %v1308_v18 }
 0x124   : > { %v1423_v35 = vpop.f32.mrf.mxu3  ;;  %v1430_v51 = vadd.f32 %v1234_v17, %v2445_v50  ;;  %v1364_v50 = vadd.f32 %v1363_v30, %v1334_v56 }
 0x126   : > { %v1397_v1 = vadd.f32 %v1396_v34, %v1364_v50 }
 0x128   : > { %v2058_v12 = vpop.eup %2057  ;;  %v1424_v8 = vadd.f32 %v1423_v35, %v1397_v1 }
 0x129   : > { %v1486_v19 = vadd.f32 1.0, %v2058_v12 }
 0x12a   : > { %v1431_v14 = vadd.f32 %v1424_v8, %v2465_v33 }
 0x12b   : > { %2059 = vrcp.f32 %v1486_v19  ;;  %v1369_v37 = vpop.f32.mrf.mxu1  ;;  %v1400_v60 = vpop.f32.mrf.mxu2  ;;  %v1499_v55 = vand.u32 2147483648, %v1486_v19  ;;  %v1497_v46 = vand.u32 2147483647, %v1486_v19  ;;  %vm1493_vm14 = vweird.f32 %v1486_v19 }
 0x12c   : > { %v1370_v42 = vadd.f32 %v1369_v37, %v1339_v22  ;;  %v1427_v44 = vpop.f32.mrf.mxu3  ;;  %2061 = vtanh.f32 %v1430_v51 }
 0x12d   : > { %v1500_v6 = vor.u32 1.1754944e-38, %v1499_v55  ;;  %vm1498_vm0 = vcmp.eq.f32.partialorder %v1497_v46, 8.507059e+37  ;;  %v1818_v55 = vld [vmem:[%s392_s13 + $0x8] sm:$0x3f] }
 0x12e   : > { %v1401_v49 = vadd.f32 %v1400_v60, %v1370_v42 }
 0x130   : > { %v1428_v43 = vadd.f32 %v1427_v44, %v1401_v49  ;;  %v1817_v44 = vld [vmem:[%s392_s13] sm:$0x3f] }
 0x131   : > { %v2060_v3 = vpop.eup %2059 }
 0x132   : > { %v1489_v27 = vmul.f32 %v2060_v3, %v1486_v19  ;;  %v1433_v28 = vadd.f32 %v1428_v43, %v1032_v5  ;;  %vm1494_vm13 = vweird.f32 %v2060_v3  ;;  %v2062_v63 = vpop.eup %2061 }
 0x133   : > { %vm1495_vm15 = vmor %vm1493_vm14, %vm1494_vm13 }
 0x134   : > { %v1490_v53 = vsub.f32 1.0, %v1489_v27  ;;  %v2013_v45 = vmul.f32 -1.442695, %v1433_v28 }
 0x136   : > { %2063 = vpow2.f32 %v2013_v45  ;;  %v1491_v16 = vmul.f32 %v2060_v3, %v1490_v53 }
 0x138   : > { %v1492_v58 = vadd.f32 %v2060_v3, %v1491_v16 }
 0x13a   : > { %v1496_v62 = vsel %vm1495_vm15, %v2060_v3, %v1492_v58 }
 0x13b   : > { %v1501_v61 = vsel %vm1498_vm0, %v1500_v6, %v1496_v62 }
 0x13c   : > { %v2064_v47 = vpop.eup %2063  ;;  %v1518_v0 = vmul.f32 %v2062_v63, %v1501_v61 }
 0x13d   : > { %v1487_v40 = vadd.f32 1.0, %v2064_v47 }
 0x13e   : > { %v1540_v4 = vand.u32 4294901760, %v1518_v0 }
 0x13f   : > { %2065 = vrcp.f32 %v1487_v40  ;;  %v1514_v25 = vand.u32 2147483648, %v1487_v40  ;;  %v1512_v29 = vand.u32 2147483647, %v1487_v40  ;;  %vm1508_vm2 = vweird.f32 %v1487_v40 }
 0x140   : > { %1541 = vmatpush.msra.mxu0 %v1540_v4  ;;  %1617 = vmatpush.msra.mxu3 %v1540_v4  ;;  %v1567_v7 = vsub.f32 %v1518_v0, %v1540_v4  ;;  %2067 = vtanh.f32 %v1431_v14 }
 0x141   : > { %1547 = vmatmul.f32.vlgmr.msra.gmra.mxu0 %v1546_v2  ;;  %1621 = vmatmul.f32.vlgmr.msra.gmra.mxu3 %v2487_v23  ;;  %v1515_v34 = vor.u32 1.1754944e-38, %v1514_v25  ;;  %vm1513_vm4 = vcmp.eq.f32.partialorder %v1512_v29, 8.507059e+37 }
 0x142   : > { %1594 = vmatpush.msra.mxu2 %v1567_v7  ;;  %v1568_v9 = vand.u32 4294901760, %v1567_v7 }
 0x143   : > { %1597 = vmatmul.f32.vlgmr.msra.gmra.mxu2 %v2484_v52 }
 0x144   : > { %1643 = vmatpush.msrb.mxu0 %v1568_v9  ;;  %v1569_v10 = vsub.f32 %v1567_v7, %v1568_v9 }
 0x145   : > { %v2066_v11 = vpop.eup %2065 }
 0x146   : > { %v1504_v15 = vmul.f32 %v2066_v11, %v1487_v40  ;;  %v1570_v20 = vand.u32 4294901760, %v1569_v10  ;;  %vm1509_vm1 = vweird.f32 %v2066_v11  ;;  %v2068_v33 = vpop.eup %2067 }
 0x147   : > { %vm1510_vm3 = vmor %vm1508_vm2, %vm1509_vm1 }
 0x148   : > { %v1505_v24 = vsub.f32 1.0, %v1504_v15  ;;  %1571 = vmatpush.msra.mxu1 %v1570_v20 }
 0x149   : > { %1645 = vmatmul.f32.vlgmr.msrb.gmra.mxu0 %v2479_v48  ;;  %1573 = vmatmul.f32.vlgmr.msra.gmra.mxu1 %v2479_v48 }
 0x14a   : > { %1665 = vmatpush.msrb.mxu1 %v1540_v4  ;;  %v1506_v26 = vmul.f32 %v2066_v11, %v1505_v24 }
 0x14c   : > { %v1507_v30 = vadd.f32 %v2066_v11, %v1506_v26 }
 0x14e   : > { %v1511_v35 = vsel %vm1510_vm3, %v2066_v11, %v1507_v30 }
 0x14f   : > { %v1516_v21 = vsel %vm1513_vm4, %v1515_v34, %v1511_v35 }
 0x150   : > { %v1519_v31 = vmul.f32 %v2068_v33, %v1516_v21 }
 0x151   : > { %1667 = vmatmul.f32.vlgmr.msrb.gmra.mxu1 %v2479_v48 }
 0x152   : > { %v1686_v38 = vand.u32 4294901760, %v1519_v31 }
 0x154   : > { %1687 = vmatpush.msrb.mxu2 %v1686_v38  ;;  %1763 = vmatpush.msra.mxu1 %v1686_v38  ;;  %v1713_v41 = vsub.f32 %v1519_v31, %v1686_v38 }
 0x155   : > { %1693 = vmatmul.f32.vlgmr.msrb.gmra.mxu2 %v1546_v2 }
 0x156   : > { %1740 = vmatpush.msra.mxu0 %v1713_v41  ;;  %v1714_v12 = vand.u32 4294901760, %v1713_v41 }
 0x157   : > { %1743 = vmatmul.f32.vlgmr.msra.gmra.mxu0 %v2484_v52 }
 0x158   : > { %1789 = vmatpush.msra.mxu2 %v1714_v12  ;;  %v1715_v13 = vsub.f32 %v1713_v41, %v1714_v12 }
 0x159   : > { %1767 = vmatmul.f32.vlgmr.msra.gmra.mxu1 %v2487_v23 }
 0x15a   : > { %v1716_v18 = vand.u32 4294901760, %v1715_v13 }
 0x15c   : > { %1717 = vmatpush.msrb.mxu3 %v1716_v18 }
 0x15d   : > { %1791 = vmatmul.f32.vlgmr.msra.gmra.mxu2 %v2479_v48  ;;  %1719 = vmatmul.f32.vlgmr.msrb.gmra.mxu3 %v2479_v48 }
 0x15e   : > { %1811 = vmatpush.msra.mxu3 %v1686_v38 }
 0x165   : > { %1813 = vmatmul.f32.vlgmr.msra.gmra.mxu3 %v2479_v48 }
 0x1be   : > { %v1548_v57 = vpop.f32.mrf.mxu0 }
 0x1c4   : > { %v1622_v36 = vpop.f32.mrf.mxu3 }
 0x1c6   : > { %v1574_v19 = vpop.f32.mrf.mxu1  ;;  %v1598_v22 = vpop.f32.mrf.mxu2 }
 0x1c7   : > { %v1575_v32 = vadd.f32 %v1574_v19, %v1548_v57  ;;  %v1646_v39 = vpop.f32.mrf.mxu0 }
 0x1c9   : > { %v1599_v37 = vadd.f32 %v1598_v22, %v1575_v32 }
 0x1cb   : > { %v1623_v42 = vadd.f32 %v1622_v36, %v1599_v37 }
 0x1cd   : > { %v1647_v60 = vadd.f32 %v1646_v39, %v1623_v42 }
 0x1ce   : > { %v1668_v17 = vpop.f32.mrf.mxu1 }
 0x1cf   : > { %v1669_v49 = vadd.f32 %v1668_v17, %v1647_v60 }
 0x1d1   : > { %v1819_v48 = vadd.f32 %v1817_v44, %v1669_v49 }
 0x1d3   : > { %1821 = vst [vmem:[%s412_s16] sm:$0x3f] %v1819_v48 }
 0x1d4   : > { %v1744_v3 = vpop.f32.mrf.mxu0 }
 0x1d6   : > { %v1768_v52 = vpop.f32.mrf.mxu1 }
 0x1d8   : > { %v1694_v5 = vpop.f32.mrf.mxu2 }
 0x1e0   : > { %v1720_v43 = vpop.f32.mrf.mxu3  ;;  %v1792_v28 = vpop.f32.mrf.mxu2 }
 0x1e1   : > { %v1721_v51 = vadd.f32 %v1720_v43, %v1694_v5 }
 0x1e3   : > { %v1745_v27 = vadd.f32 %v1744_v3, %v1721_v51 }
 0x1e5   : > { %v1769_v53 = vadd.f32 %v1768_v52, %v1745_v27 }
 0x1e7   : > { %v1793_v45 = vadd.f32 %v1792_v28, %v1769_v53 }
 0x1e8   : > { %v1814_v54 = vpop.f32.mrf.mxu3 }
 0x1e9   : > { %v1815_v23 = vadd.f32 %v1814_v54, %v1793_v45 }
 0x1eb   : > { %v1820_v16 = vadd.f32 %v1818_v55, %v1815_v23 }
 0x1ed   : > { %1822 = vst [vmem:[%s412_s16 + $0x8] sm:$0x3f] %v1820_v16 }
 0x1ee PF: > { %s18_s26 = sadd.s32 1, %s2091_s26   ;;  %s2527_s24 = smov %s2087_s25 }
 0x1ef   : > { %p15_p5 = scmp.ge.s32.totalorder %s18_s26, 4   ;;  %s2528_s25 = smov %s2530_s27 }
 0x1f1   :  { %17 = sbr.rel (!%p15_p5) target bundleno = 2 (0x2), region = 92 }

</bundles_post_ra>
